<compile_context>
chip_gen: v6e
topology: v6e:2x2x1
jax: 0.10.0
libtpu: 0.0.40
codegen_flags: <defaults>
</compile_context>

<pallas_src>
import functools

import jax
import jax.numpy as jnp
from jax.experimental import pallas as pl
from jax.experimental.pallas import tpu as pltpu

N_PAD = 128  # lane-dense padded output width (true N = 10)


def _linear_kernel(x_ref, w_ref, b_ref, o_ref):
    # x_ref: (TB, 784)   w_ref: (784, 128)   b_ref: (1, 128)   o_ref: (TB, 128)
    acc = jnp.dot(x_ref[...], w_ref[...], preferred_element_type=jnp.float32)
    o_ref[...] = (acc + b_ref[...]).astype(o_ref.dtype)


@functools.partial(jax.jit, static_argnames=("tb",))
def mnist_logistic_forward(x, weight, bias, *, tb=None):
    """Forward pass of nn.Linear(784, 10): y = x @ weight.T + bias.

    x:      (B, 784) float32
    weight: (10, 784) float32  (PyTorch layout)
    bias:   (10,)    float32
    returns (B, 10)  float32
    """
    B, K = x.shape
    N = weight.shape[0]

    # Pre-transpose + lane-pad the (tiny) weight and bias in the wrapper.
    w_t = jnp.zeros((K, N_PAD), weight.dtype).at[:, :N].set(weight.T)
    b_p = jnp.zeros((1, N_PAD), bias.dtype).at[:, :N].set(bias[None, :])

    # Batch tile: multiple of 8 sublanes, as large as reasonable, capped at 1024.
    if tb is None:
        tb = min(1024, ((B + 7) // 8) * 8)
    b_pad = pl.cdiv(B, tb) * tb
    if b_pad != B:
        x = jnp.pad(x, ((0, b_pad - B), (0, 0)))

    grid = (b_pad // tb,)

    out_padded = pl.pallas_call(
        _linear_kernel,
        out_shape=jax.ShapeDtypeStruct((b_pad, N_PAD), jnp.float32),
        grid=grid,
        in_specs=[
            pl.BlockSpec((tb, K), lambda i: (i, 0)),       # stream x over batch
            pl.BlockSpec((K, N_PAD), lambda i: (0, 0)),    # weight: VMEM-resident
            pl.BlockSpec((1, N_PAD), lambda i: (0, 0)),    # bias:   VMEM-resident
        ],
        out_specs=pl.BlockSpec((tb, N_PAD), lambda i: (i, 0)),
        compiler_params=pltpu.CompilerParams(
            dimension_semantics=("parallel",),
        ),
    )(x, w_t, b_p)

    return out_padded[:B, :N]


if __name__ == "__main__":
    key = jax.random.PRNGKey(0)
    k_x, k_w, k_b = jax.random.split(key, 3)

    bs = 64  # same batch size as the tutorial
    x = jax.random.normal(k_x, (bs, 784), dtype=jnp.float32)
    # nn.Linear(784, 10) default init scale ~ 1/sqrt(784)
    weight = jax.random.uniform(
        k_w, (10, 784), dtype=jnp.float32, minval=-1.0, maxval=1.0
    ) / jnp.sqrt(784.0)
    bias = jax.random.uniform(
        k_b, (10,), dtype=jnp.float32, minval=-1.0, maxval=1.0
    ) / jnp.sqrt(784.0)

    out = mnist_logistic_forward(x, weight, bias)
    out = jax.block_until_ready(out)

    # Sanity check against plain-JAX reference (loose tolerance for MXU f32).
    ref = x @ weight.T + bias[None, :]
    assert out.shape == (bs, 10)
    assert jnp.allclose(out, ref, rtol=1e-2, atol=1e-2)

    print("KERNEL_OK")
</pallas_src>

<mosaic_0001>
module attributes {stable_mosaic.version = 11 : i64} {
  func.func @_linear_kernel(%arg0: i32, %arg1: memref<64x784xf32, #tpu.memory_space<vmem>>, %arg2: memref<784x128xf32, #tpu.memory_space<vmem>>, %arg3: memref<1x128xf32, #tpu.memory_space<vmem>>, %arg4: memref<64x128xf32, #tpu.memory_space<vmem>>) attributes {dimension_semantics = [#tpu.dimension_semantics<parallel>], iteration_bounds = array<i64: 1>, scalar_prefetch = 0 : i64, scratch_operands = 0 : i64, tpu.core_type = #tpu.core_type<tc>, window_params = [{transform_indices = @transform_0, window_bounds = array<i64: 64, 784>}, {pipeline_mode = #tpu.pipeline_mode<synchronous>, transform_indices = @transform_1, window_bounds = array<i64: 784, 128>}, {pipeline_mode = #tpu.pipeline_mode<synchronous>, transform_indices = @transform_2, window_bounds = array<i64: 1, 128>}, {transform_indices = @transform_3, window_bounds = array<i64: 64, 128>}]} {
    %c0 = arith.constant 0 : index
    %c0_0 = arith.constant 0 : index
    %0 = vector.load %arg1[%c0, %c0_0] : memref<64x784xf32, #tpu.memory_space<vmem>>, vector<64x784xf32>
    %c0_1 = arith.constant 0 : index
    %c0_2 = arith.constant 0 : index
    %1 = vector.load %arg2[%c0_1, %c0_2] : memref<784x128xf32, #tpu.memory_space<vmem>>, vector<784x128xf32>
    %cst = arith.constant dense<0.000000e+00> : vector<64x128xf32>
    %2 = tpu.matmul %0, %1, %cst {dimension_numbers = #tpu.dot_dimension_numbers<[1], [0], [0], [1], [0, 0, 1, 1], [], []>} : vector<64x784xf32>, vector<784x128xf32>, vector<64x128xf32> -> vector<64x128xf32>
    %c0_3 = arith.constant 0 : index
    %c0_4 = arith.constant 0 : index
    %3 = vector.load %arg3[%c0_3, %c0_4] : memref<1x128xf32, #tpu.memory_space<vmem>>, vector<1x128xf32>
    %4 = vector.broadcast %3 : vector<1x128xf32> to vector<64x128xf32>
    %5 = arith.addf %2, %4 : vector<64x128xf32>
    %c0_5 = arith.constant 0 : index
    %c0_6 = arith.constant 0 : index
    %6 = vector.load %arg4[%c0_5, %c0_6] : memref<64x128xf32, #tpu.memory_space<vmem>>, vector<64x128xf32>
    tpu.vector_store %arg4[%c0_5, %c0_6], %5 {strides = array<i32>} : memref<64x128xf32, #tpu.memory_space<vmem>>, vector<64x128xf32>,
    return
  }
  func.func @transform_0(%arg0: i32) -> (i32, i32) {
    %c0_i32 = arith.constant 0 : i32
    %c0_i32_0 = arith.constant 0 : i32
    return %arg0, %c0_i32 : i32, i32
  }
  func.func @transform_1(%arg0: i32) -> (i32, i32) {
    %c0_i32 = arith.constant 0 : i32
    %c0_i32_0 = arith.constant 0 : i32
    %c0_i32_1 = arith.constant 0 : i32
    return %c0_i32, %c0_i32_0 : i32, i32
  }
  func.func @transform_2(%arg0: i32) -> (i32, i32) {
    %c0_i32 = arith.constant 0 : i32
    %c0_i32_0 = arith.constant 0 : i32
    %c0_i32_1 = arith.constant 0 : i32
    return %c0_i32, %c0_i32_0 : i32, i32
  }
  func.func @transform_3(%arg0: i32) -> (i32, i32) {
    %c0_i32 = arith.constant 0 : i32
    %c0_i32_0 = arith.constant 0 : i32
    return %arg0, %c0_i32 : i32, i32
  }
}

</mosaic_0001>

<bundles_post_ra>
// kernel: mnist_logistic_forward.1
= control target key start
LH: loop header
LB: loop body
LE: loop exit
PB: predicated region body
PF: predicated region fallthrough
CT: control target
= control target key end

     0   :  { %vm175_vm0 = vcmask 130048   ;;  %s1393_s1 = inlined_call_operand.vmem [shape: f32[784,128], index: 1, kind: input, shape index: {}]   ;;  %s1394_s0 = inlined_call_operand.vmem [shape: f32[64,784], index: 0, kind: input, shape index: {}]   ;;  %s1395_s2 = inlined_call_operand.vmem [shape: f32[1,128], index: 2, kind: input, shape index: {}]   ;;  %s1396_s3 = inlined_call_operand.vmem [shape: f32[64,128], index: 3, kind: output, shape index: {}]  }
   0x1   :  { %v101_v0 = vld [vmem:[%s1393_s1 + $0xf8] sm:$0xff]  ;;  %v100_v4 = vld [vmem:[%s1393_s1 + $0xf0] sm:$0xff]  ;;  %v99_v8 = vld [vmem:[%s1393_s1 + $0xe8] sm:$0xff] }
   0x2   :  { %v133_v1 = vld [vmem:[%s1393_s1 + $0x1f8] sm:$0xff]  ;;  %641 = vmatprep.subr.mxu0 %v101_v0  ;;  %v132_v5 = vld [vmem:[%s1393_s1 + $0x1f0] sm:$0xff]  ;;  %v131_v9 = vld [vmem:[%s1393_s1 + $0x1e8] sm:$0xff] }
   0x3   :  { %v85_v2 = vld [vmem:[%s1393_s1 + $0x78] sm:$0xff]  ;;  %697 = vmatprep.subr.mxu1 %v133_v1  ;;  %v84_v6 = vld [vmem:[%s1393_s1 + $0x70] sm:$0xff]  ;;  %v83_v10 = vld [vmem:[%s1393_s1 + $0x68] sm:$0xff] }
   0x4   :  { %v117_v3 = vld [vmem:[%s1393_s1 + $0x178] sm:$0xff]  ;;  %642 = vmatpush3.msra.mxu0 %v85_v2  ;;  %v116_v7 = vld [vmem:[%s1393_s1 + $0x170] sm:$0xff]  ;;  %v115_v11 = vld [vmem:[%s1393_s1 + $0x168] sm:$0xff] }
   0x5   :  { %698 = vmatpush3.msra.mxu1 %v117_v3  ;;  %643 = vmatprep.subr.mxu0 %v100_v4  ;;  %v98_v12 = vld [vmem:[%s1393_s1 + $0xe0] sm:$0xff]  ;;  %v97_v16 = vld [vmem:[%s1393_s1 + $0xd8] sm:$0xff]  ;;  %v96_v20 = vld [vmem:[%s1393_s1 + $0xd0] sm:$0xff] }
   0x6   :  { %699 = vmatprep.subr.mxu1 %v132_v5  ;;  %644 = vmatpush3.msra.mxu0 %v84_v6  ;;  %v130_v13 = vld [vmem:[%s1393_s1 + $0x1e0] sm:$0xff]  ;;  %v129_v17 = vld [vmem:[%s1393_s1 + $0x1d8] sm:$0xff]  ;;  %v128_v21 = vld [vmem:[%s1393_s1 + $0x1d0] sm:$0xff] }
   0x7   :  { %700 = vmatpush3.msra.mxu1 %v116_v7  ;;  %645 = vmatprep.subr.mxu0 %v99_v8  ;;  %v82_v14 = vld [vmem:[%s1393_s1 + $0x60] sm:$0xff]  ;;  %v81_v18 = vld [vmem:[%s1393_s1 + $0x58] sm:$0xff]  ;;  %v80_v22 = vld [vmem:[%s1393_s1 + $0x50] sm:$0xff] }
   0x8   :  { %701 = vmatprep.subr.mxu1 %v131_v9  ;;  %v114_v15 = vld [vmem:[%s1393_s1 + $0x160] sm:$0xff]  ;;  %646 = vmatpush3.msra.mxu0 %v83_v10  ;;  %v113_v19 = vld [vmem:[%s1393_s1 + $0x158] sm:$0xff]  ;;  %v112_v23 = vld [vmem:[%s1393_s1 + $0x150] sm:$0xff] }
   0x9   :  { %702 = vmatpush3.msra.mxu1 %v115_v11  ;;  %647 = vmatprep.subr.mxu0 %v98_v12  ;;  %v95_v24 = vld [vmem:[%s1393_s1 + $0xc8] sm:$0xff]  ;;  %v94_v28 = vld [vmem:[%s1393_s1 + $0xc0] sm:$0xff]  ;;  %v93_v32 = vld [vmem:[%s1393_s1 + $0xb8] sm:$0xff] }
   0xa   :  { %703 = vmatprep.subr.mxu1 %v130_v13  ;;  %648 = vmatpush3.msra.mxu0 %v82_v14  ;;  %v127_v25 = vld [vmem:[%s1393_s1 + $0x1c8] sm:$0xff]  ;;  %v126_v29 = vld [vmem:[%s1393_s1 + $0x1c0] sm:$0xff]  ;;  %v125_v33 = vld [vmem:[%s1393_s1 + $0x1b8] sm:$0xff] }
   0xb   :  { %704 = vmatpush3.msra.mxu1 %v114_v15  ;;  %649 = vmatprep.subr.mxu0 %v97_v16  ;;  %v79_v26 = vld [vmem:[%s1393_s1 + $0x48] sm:$0xff]  ;;  %v78_v30 = vld [vmem:[%s1393_s1 + $0x40] sm:$0xff]  ;;  %v77_v34 = vld [vmem:[%s1393_s1 + $0x38] sm:$0xff] }
   0xc   :  { %705 = vmatprep.subr.mxu1 %v129_v17  ;;  %650 = vmatpush3.msra.mxu0 %v81_v18  ;;  %v111_v27 = vld [vmem:[%s1393_s1 + $0x148] sm:$0xff]  ;;  %v110_v31 = vld [vmem:[%s1393_s1 + $0x140] sm:$0xff]  ;;  %v109_v35 = vld [vmem:[%s1393_s1 + $0x138] sm:$0xff] }
   0xd   :  { %706 = vmatpush3.msra.mxu1 %v113_v19  ;;  %651 = vmatprep.subr.mxu0 %v96_v20  ;;  %v92_v36 = vld [vmem:[%s1393_s1 + $0xb0] sm:$0xff]  ;;  %v91_v40 = vld [vmem:[%s1393_s1 + $0xa8] sm:$0xff]  ;;  %v90_v44 = vld [vmem:[%s1393_s1 + $0xa0] sm:$0xff] }
   0xe   :  { %707 = vmatprep.subr.mxu1 %v128_v21  ;;  %652 = vmatpush3.msra.mxu0 %v80_v22  ;;  %v124_v37 = vld [vmem:[%s1393_s1 + $0x1b0] sm:$0xff]  ;;  %v123_v41 = vld [vmem:[%s1393_s1 + $0x1a8] sm:$0xff]  ;;  %v122_v45 = vld [vmem:[%s1393_s1 + $0x1a0] sm:$0xff] }
   0xf   :  { %708 = vmatpush3.msra.mxu1 %v112_v23  ;;  %653 = vmatprep.subr.mxu0 %v95_v24  ;;  %v76_v38 = vld [vmem:[%s1393_s1 + $0x30] sm:$0xff]  ;;  %v75_v42 = vld [vmem:[%s1393_s1 + $0x28] sm:$0xff]  ;;  %v74_v46 = vld [vmem:[%s1393_s1 + $0x20] sm:$0xff] }
  0x10   :  { %709 = vmatprep.subr.mxu1 %v127_v25  ;;  %654 = vmatpush3.msra.mxu0 %v79_v26  ;;  %v108_v39 = vld [vmem:[%s1393_s1 + $0x130] sm:$0xff]  ;;  %v107_v43 = vld [vmem:[%s1393_s1 + $0x128] sm:$0xff]  ;;  %v106_v47 = vld [vmem:[%s1393_s1 + $0x120] sm:$0xff] }
  0x11   :  { %710 = vmatpush3.msra.mxu1 %v111_v27  ;;  %655 = vmatprep.subr.mxu0 %v94_v28  ;;  %v89_v48 = vld [vmem:[%s1393_s1 + $0x98] sm:$0xff]  ;;  %v88_v52 = vld [vmem:[%s1393_s1 + $0x90] sm:$0xff]  ;;  %v87_v56 = vld [vmem:[%s1393_s1 + $0x88] sm:$0xff] }
  0x12   :  { %711 = vmatprep.subr.mxu1 %v126_v29  ;;  %656 = vmatpush3.msra.mxu0 %v78_v30  ;;  %v121_v49 = vld [vmem:[%s1393_s1 + $0x198] sm:$0xff]  ;;  %v120_v53 = vld [vmem:[%s1393_s1 + $0x190] sm:$0xff]  ;;  %v119_v57 = vld [vmem:[%s1393_s1 + $0x188] sm:$0xff] }
  0x13   :  { %712 = vmatpush3.msra.mxu1 %v110_v31  ;;  %657 = vmatprep.subr.mxu0 %v93_v32  ;;  %v73_v50 = vld [vmem:[%s1393_s1 + $0x18] sm:$0xff]  ;;  %v72_v54 = vld [vmem:[%s1393_s1 + $0x10] sm:$0xff]  ;;  %v71_v58 = vld [vmem:[%s1393_s1 + $0x8] sm:$0xff] }
  0x14   :  { %713 = vmatprep.subr.mxu1 %v125_v33  ;;  %658 = vmatpush3.msra.mxu0 %v77_v34  ;;  %v105_v51 = vld [vmem:[%s1393_s1 + $0x118] sm:$0xff]  ;;  %v104_v55 = vld [vmem:[%s1393_s1 + $0x110] sm:$0xff]  ;;  %v103_v59 = vld [vmem:[%s1393_s1 + $0x108] sm:$0xff] }
  0x15   :  { %714 = vmatpush3.msra.mxu1 %v109_v35  ;;  %659 = vmatprep.subr.mxu0 %v92_v36  ;;  %v86_v60 = vld [vmem:[%s1393_s1 + $0x80] sm:$0xff]  ;;  %v15_v63 = vld [vmem:[%s1394_s0 + $0x8] sm:$0xff]  ;;  %v17_v1 = vld [vmem:[%s1394_s0 + $0x18] sm:$0xff] }
  0x16   :  { %715 = vmatprep.subr.mxu1 %v124_v37  ;;  %660 = vmatpush3.msra.mxu0 %v76_v38  ;;  %v118_v61 = vld [vmem:[%s1393_s1 + $0x180] sm:$0xff]  ;;  %v16_v3 = vld [vmem:[%s1394_s0 + $0x10] sm:$0xff]  ;;  %v165_v4 = vld [vmem:[%s1393_s1 + $0x2f8] sm:$0xff] }
  0x17   :  { %716 = vmatpush3.msra.mxu1 %v108_v39  ;;  %661 = vmatprep.subr.mxu0 %v91_v40  ;;  %v70_v62 = vld [vmem:[%s1393_s1] sm:$0xff]  ;;  %v149_v5 = vld [vmem:[%s1393_s1 + $0x278] sm:$0xff]  ;;  %v164_v6 = vld [vmem:[%s1393_s1 + $0x2f0] sm:$0xff] }
  0x18   :  { %717 = vmatprep.subr.mxu1 %v123_v41  ;;  %662 = vmatpush3.msra.mxu0 %v75_v42  ;;  %v102_v0 = vld [vmem:[%s1393_s1 + $0x100] sm:$0xff]  ;;  %v24_v8 = vld [vmem:[%s1394_s0 + $0x50] sm:$0xff]  ;;  %v21_v10 = vld [vmem:[%s1394_s0 + $0x38] sm:$0xff] }
  0x19   :  { %718 = vmatpush3.msra.mxu1 %v107_v43  ;;  %663 = vmatprep.subr.mxu0 %v90_v44  ;;  %v14_v2 = vld [vmem:[%s1394_s0] sm:$0xff]  ;;  %v148_v9 = vld [vmem:[%s1393_s1 + $0x270] sm:$0xff]  ;;  %v23_v11 = vld [vmem:[%s1394_s0 + $0x48] sm:$0xff] }
  0x1a   :  { %719 = vmatprep.subr.mxu1 %v122_v45  ;;  %664 = vmatpush3.msra.mxu0 %v74_v46  ;;  %v22_v7 = vld [vmem:[%s1394_s0 + $0x40] sm:$0xff]  ;;  %v163_v12 = vld [vmem:[%s1393_s1 + $0x2e8] sm:$0xff]  ;;  %v29_v15 = vld [vmem:[%s1394_s0 + $0x78] sm:$0xff] }
  0x1b   :  { %720 = vmatpush3.msra.mxu1 %v106_v47  ;;  %665 = vmatprep.subr.mxu0 %v89_v48  ;;  %v147_v13 = vld [vmem:[%s1393_s1 + $0x268] sm:$0xff]  ;;  %v162_v14 = vld [vmem:[%s1393_s1 + $0x2e0] sm:$0xff]  ;;  %v28_v18 = vld [vmem:[%s1394_s0 + $0x70] sm:$0xff] }
  0x1c   :  { %721 = vmatprep.subr.mxu1 %v121_v49  ;;  %666 = vmatpush3.msra.mxu0 %v73_v50  ;;  %v31_v16 = vld [vmem:[%s1394_s0 + $0x88] sm:$0xff]  ;;  %v146_v17 = vld [vmem:[%s1393_s1 + $0x260] sm:$0xff]  ;;  %v161_v20 = vld [vmem:[%s1393_s1 + $0x2d8] sm:$0xff] }
  0x1d   :  { %722 = vmatpush3.msra.mxu1 %v105_v51  ;;  %667 = vmatprep.subr.mxu0 %v88_v52  ;;  %v30_v19 = vld [vmem:[%s1394_s0 + $0x80] sm:$0xff]  ;;  %v145_v21 = vld [vmem:[%s1393_s1 + $0x258] sm:$0xff]  ;;  %v160_v22 = vld [vmem:[%s1393_s1 + $0x2d0] sm:$0xff] }
  0x1e   :  { %723 = vmatprep.subr.mxu1 %v120_v53  ;;  %668 = vmatpush3.msra.mxu0 %v72_v54  ;;  %v36_v23 = vld [vmem:[%s1394_s0 + $0xb0] sm:$0xff]  ;;  %v38_v24 = vld [vmem:[%s1394_s0 + $0xc0] sm:$0xff]  ;;  %v35_v26 = vld [vmem:[%s1394_s0 + $0xa8] sm:$0xff] }
  0x1f   :  { %724 = vmatpush3.msra.mxu1 %v104_v55  ;;  %669 = vmatprep.subr.mxu0 %v87_v56  ;;  %v144_v25 = vld [vmem:[%s1393_s1 + $0x250] sm:$0xff]  ;;  %v37_v27 = vld [vmem:[%s1394_s0 + $0xb8] sm:$0xff]  ;;  %v159_v28 = vld [vmem:[%s1393_s1 + $0x2c8] sm:$0xff] }
  0x20   :  { %725 = vmatprep.subr.mxu1 %v119_v57  ;;  %670 = vmatpush3.msra.mxu0 %v71_v58  ;;  %v143_v29 = vld [vmem:[%s1393_s1 + $0x248] sm:$0xff]  ;;  %v158_v30 = vld [vmem:[%s1393_s1 + $0x2c0] sm:$0xff]  ;;  %v45_v32 = vld [vmem:[%s1394_s0 + $0xf8] sm:$0xff] }
  0x21   :  { %726 = vmatpush3.msra.mxu1 %v103_v59  ;;  %671 = vmatprep.subr.mxu0 %v86_v60  ;;  %v43_v31 = vld [vmem:[%s1394_s0 + $0xe8] sm:$0xff]  ;;  %v142_v33 = vld [vmem:[%s1393_s1 + $0x240] sm:$0xff]  ;;  %v44_v35 = vld [vmem:[%s1394_s0 + $0xf0] sm:$0xff] }
  0x22   :  { %727 = vmatprep.subr.mxu1 %v118_v61  ;;  %672 = vmatpush3.msra.mxu0 %v70_v62  ;;  %v42_v34 = vld [vmem:[%s1394_s0 + $0xe0] sm:$0xff]  ;;  %v157_v36 = vld [vmem:[%s1393_s1 + $0x2b8] sm:$0xff]  ;;  %v156_v38 = vld [vmem:[%s1393_s1 + $0x2b0] sm:$0xff] }
  0x23   :  { %264 = vmatprep.mubr.f32.mxu0 %v15_v63  ;;  %728 = vmatpush3.msra.mxu1 %v102_v0  ;;  %v141_v37 = vld [vmem:[%s1393_s1 + $0x238] sm:$0xff]  ;;  %v50_v39 = vld [vmem:[%s1394_s0 + $0x120] sm:$0xff]  ;;  %v52_v40 = vld [vmem:[%s1394_s0 + $0x130] sm:$0xff] }
  0x24   :  { %369 = vmatprep.mubr.f32.mxu1 %v17_v1  ;;  %265 = vmatmul.mubr.f32.vlgmr.msra.gmra.mxu0 %v14_v2  ;;  %v140_v41 = vld [vmem:[%s1393_s1 + $0x230] sm:$0xff]  ;;  %v49_v42 = vld [vmem:[%s1394_s0 + $0x118] sm:$0xff]  ;;  %v51_v43 = vld [vmem:[%s1394_s0 + $0x128] sm:$0xff] }
  0x25   :  { %370 = vmatmul.mubr.f32.vlgmr.msra.gmra.mxu1 %v16_v3  ;;  %753 = vmatprep.subr.mxu0 %v165_v4  ;;  %v155_v44 = vld [vmem:[%s1393_s1 + $0x2a8] sm:$0xff]  ;;  %v154_v46 = vld [vmem:[%s1393_s1 + $0x2a0] sm:$0xff]  ;;  %v57_v47 = vld [vmem:[%s1394_s0 + $0x158] sm:$0xff] }
  0x26   :  { %835 = vmatprep.subr.mxu1 %v165_v4  ;;  %754 = vmatpush3.msra.mxu0 %v149_v5  ;;  %v139_v45 = vld [vmem:[%s1393_s1 + $0x228] sm:$0xff]  ;;  %v138_v49 = vld [vmem:[%s1393_s1 + $0x220] sm:$0xff]  ;;  %v56_v50 = vld [vmem:[%s1394_s0 + $0x150] sm:$0xff] }
  0x27   :  { %851 = vmatpush3.msra.mxu1 %v149_v5  ;;  %755 = vmatprep.subr.mxu0 %v164_v6  ;;  %v59_v48 = vld [vmem:[%s1394_s0 + $0x168] sm:$0xff]  ;;  %v58_v51 = vld [vmem:[%s1394_s0 + $0x160] sm:$0xff]  ;;  %v153_v52 = vld [vmem:[%s1393_s1 + $0x298] sm:$0xff] }
  0x28   :  { %836 = vmatprep.subr.mxu1 %v164_v6  ;;  %269 = vmatprep.mubr.f32.mxu0 %v22_v7  ;;  %v137_v53 = vld [vmem:[%s1393_s1 + $0x218] sm:$0xff]  ;;  %v152_v54 = vld [vmem:[%s1393_s1 + $0x290] sm:$0xff]  ;;  %v66_v56 = vld [vmem:[%s1394_s0 + $0x1a0] sm:$0xff] }
  0x29   :  { %374 = vmatprep.mubr.f32.mxu1 %v24_v8  ;;  %756 = vmatpush3.msra.mxu0 %v148_v9  ;;  %v64_v55 = vld [vmem:[%s1394_s0 + $0x190] sm:$0xff]  ;;  %v63_v58 = vld [vmem:[%s1394_s0 + $0x188] sm:$0xff]  ;;  %v65_v59 = vld [vmem:[%s1394_s0 + $0x198] sm:$0xff] }
  0x2a   :  { %852 = vmatpush3.msra.mxu1 %v148_v9  ;;  %270 = vmatmul.mubr.f32.gmra.mxu0 %v21_v10  ;;  %v136_v57 = vld [vmem:[%s1393_s1 + $0x210] sm:$0xff]  ;;  %v151_v60 = vld [vmem:[%s1393_s1 + $0x288] sm:$0xff]  ;;  %v150_v62 = vld [vmem:[%s1393_s1 + $0x280] sm:$0xff] }
  0x2b   :  { %375 = vmatmul.mubr.f32.gmra.mxu1 %v23_v11  ;;  %757 = vmatprep.subr.mxu0 %v163_v12  ;;  %v135_v61 = vld [vmem:[%s1393_s1 + $0x208] sm:$0xff]  ;;  %v134_v63 = vld [vmem:[%s1393_s1 + $0x200] sm:$0xff]  ;;  %v61_v1 = vld [vmem:[%s1394_s0 + $0x178] sm:$0xff] }
  0x2c   :  { %837 = vmatprep.subr.mxu1 %v163_v12  ;;  %758 = vmatpush3.msra.mxu0 %v147_v13  ;;  %v19_v0 = vld [vmem:[%s1394_s0 + $0x28] sm:$0xff]  ;;  %v18_v2 = vld [vmem:[%s1394_s0 + $0x20] sm:$0xff]  ;;  %v60_v3 = vld [vmem:[%s1394_s0 + $0x170] sm:$0xff] }
  0x2d   :  { %853 = vmatpush3.msra.mxu1 %v147_v13  ;;  %759 = vmatprep.subr.mxu0 %v162_v14  ;;  %v26_v4 = vld [vmem:[%s1394_s0 + $0x60] sm:$0xff]  ;;  %v68_v5 = vld [vmem:[%s1394_s0 + $0x1b0] sm:$0xff]  ;;  %v167_v6 = vld [vmem:[%s1393_s1 + $0x308] sm:$0xff] }
  0x2e   :  { %838 = vmatprep.subr.mxu1 %v162_v14  ;;  %274 = vmatprep.mubr.f32.mxu0 %v29_v15  ;;  %v25_v7 = vld [vmem:[%s1394_s0 + $0x58] sm:$0xff]  ;;  %v67_v8 = vld [vmem:[%s1394_s0 + $0x1a8] sm:$0xff]  ;;  %v166_v9 = vld [vmem:[%s1393_s1 + $0x300] sm:$0xff] }
  0x2f   :  { %379 = vmatprep.mubr.f32.mxu1 %v31_v16  ;;  %760 = vmatpush3.msra.mxu0 %v146_v17  ;;  %v33_v10 = vld [vmem:[%s1394_s0 + $0x98] sm:$0xff]  ;;  %v20_v11 = vld [vmem:[%s1394_s0 + $0x30] sm:$0xff]  ;;  %v27_v13 = vld [vmem:[%s1394_s0 + $0x68] sm:$0xff] }
  0x30   :  { %854 = vmatpush3.msra.mxu1 %v146_v17  ;;  %275 = vmatmul.mubr.f32.gmra.mxu0 %v28_v18  ;;  %v32_v12 = vld [vmem:[%s1394_s0 + $0x90] sm:$0xff]  ;;  %v34_v15 = vld [vmem:[%s1394_s0 + $0xa0] sm:$0xff]  ;;  %v39_v16 = vld [vmem:[%s1394_s0 + $0xc8] sm:$0xff] }
  0x31   :  { %380 = vmatmul.mubr.f32.gmra.mxu1 %v30_v19  ;;  %761 = vmatprep.subr.mxu0 %v161_v20  ;;  %v40_v14 = vld [vmem:[%s1394_s0 + $0xd0] sm:$0xff]  ;;  %v41_v17 = vld [vmem:[%s1394_s0 + $0xd8] sm:$0xff]  ;;  %v47_v18 = vld [vmem:[%s1394_s0 + $0x108] sm:$0xff] }
  0x32   :  { %839 = vmatprep.subr.mxu1 %v161_v20  ;;  %762 = vmatpush3.msra.mxu0 %v145_v21  ;;  %v48_v19 = vld [vmem:[%s1394_s0 + $0x110] sm:$0xff]  ;;  %v46_v20 = vld [vmem:[%s1394_s0 + $0x100] sm:$0xff] }
  0x33   :  { %855 = vmatpush3.msra.mxu1 %v145_v21  ;;  %763 = vmatprep.subr.mxu0 %v160_v22  ;;  %v55_v21 = vld [vmem:[%s1394_s0 + $0x148] sm:$0xff] }
  0x34   :  { %840 = vmatprep.subr.mxu1 %v160_v22  ;;  %279 = vmatprep.mubr.f32.mxu0 %v36_v23  ;;  %v54_v22 = vld [vmem:[%s1394_s0 + $0x140] sm:$0xff] }
  0x35   :  { %384 = vmatprep.mubr.f32.mxu1 %v38_v24  ;;  %764 = vmatpush3.msra.mxu0 %v144_v25  ;;  %v62_v23 = vld [vmem:[%s1394_s0 + $0x180] sm:$0xff]  ;;  %v53_v24 = vld [vmem:[%s1394_s0 + $0x138] sm:$0xff] }
  0x36   :  { %856 = vmatpush3.msra.mxu1 %v144_v25  ;;  %280 = vmatmul.mubr.f32.gmra.mxu0 %v35_v26  ;;  %v69_v25 = vld [vmem:[%s1394_s0 + $0x1b8] sm:$0xff] }
  0x37   :  { %385 = vmatmul.mubr.f32.gmra.mxu1 %v37_v27  ;;  %765 = vmatprep.subr.mxu0 %v159_v28 }
  0x38   :  { %841 = vmatprep.subr.mxu1 %v159_v28  ;;  %766 = vmatpush3.msra.mxu0 %v143_v29 }
  0x39   :  { %857 = vmatpush3.msra.mxu1 %v143_v29  ;;  %767 = vmatprep.subr.mxu0 %v158_v30 }
  0x3a   :  { %842 = vmatprep.subr.mxu1 %v158_v30  ;;  %284 = vmatprep.mubr.f32.mxu0 %v43_v31 }
  0x3b   :  { %389 = vmatprep.mubr.f32.mxu1 %v45_v32  ;;  %768 = vmatpush3.msra.mxu0 %v142_v33 }
  0x3c   :  { %858 = vmatpush3.msra.mxu1 %v142_v33  ;;  %285 = vmatmul.mubr.f32.gmra.mxu0 %v42_v34 }
  0x3d   :  { %390 = vmatmul.mubr.f32.gmra.mxu1 %v44_v35  ;;  %769 = vmatprep.subr.mxu0 %v157_v36 }
  0x3e   :  { %843 = vmatprep.subr.mxu1 %v157_v36  ;;  %770 = vmatpush3.msra.mxu0 %v141_v37 }
  0x3f   :  { %859 = vmatpush3.msra.mxu1 %v141_v37  ;;  %771 = vmatprep.subr.mxu0 %v156_v38 }
  0x40   :  { %844 = vmatprep.subr.mxu1 %v156_v38  ;;  %289 = vmatprep.mubr.f32.mxu0 %v50_v39 }
  0x41   :  { %394 = vmatprep.mubr.f32.mxu1 %v52_v40  ;;  %772 = vmatpush3.msra.mxu0 %v140_v41 }
  0x42   :  { %860 = vmatpush3.msra.mxu1 %v140_v41  ;;  %290 = vmatmul.mubr.f32.gmra.mxu0 %v49_v42 }
  0x43   :  { %395 = vmatmul.mubr.f32.gmra.mxu1 %v51_v43  ;;  %773 = vmatprep.subr.mxu0 %v155_v44 }
  0x44   :  { %845 = vmatprep.subr.mxu1 %v155_v44  ;;  %774 = vmatpush3.msra.mxu0 %v139_v45 }
  0x45   :  { %861 = vmatpush3.msra.mxu1 %v139_v45  ;;  %775 = vmatprep.subr.mxu0 %v154_v46 }
  0x46   :  { %846 = vmatprep.subr.mxu1 %v154_v46  ;;  %294 = vmatprep.mubr.f32.mxu0 %v57_v47 }
  0x47   :  { %399 = vmatprep.mubr.f32.mxu1 %v59_v48  ;;  %776 = vmatpush3.msra.mxu0 %v138_v49 }
  0x48   :  { %862 = vmatpush3.msra.mxu1 %v138_v49  ;;  %295 = vmatmul.mubr.f32.gmra.mxu0 %v56_v50 }
  0x49   :  { %400 = vmatmul.mubr.f32.gmra.mxu1 %v58_v51  ;;  %777 = vmatprep.subr.mxu0 %v153_v52 }
  0x4a   :  { %847 = vmatprep.subr.mxu1 %v153_v52  ;;  %778 = vmatpush3.msra.mxu0 %v137_v53 }
  0x4b   :  { %863 = vmatpush3.msra.mxu1 %v137_v53  ;;  %779 = vmatprep.subr.mxu0 %v152_v54 }
  0x4c   :  { %848 = vmatprep.subr.mxu1 %v152_v54  ;;  %299 = vmatprep.mubr.f32.mxu0 %v64_v55 }
  0x4d   :  { %404 = vmatprep.mubr.f32.mxu1 %v66_v56  ;;  %780 = vmatpush3.msra.mxu0 %v136_v57 }
  0x4e   :  { %864 = vmatpush3.msra.mxu1 %v136_v57  ;;  %300 = vmatmul.mubr.f32.gmra.mxu0 %v63_v58 }
  0x4f   :  { %405 = vmatmul.mubr.f32.gmra.mxu1 %v65_v59  ;;  %781 = vmatprep.subr.mxu0 %v151_v60 }
  0x50   :  { %849 = vmatprep.subr.mxu1 %v151_v60  ;;  %782 = vmatpush3.msra.mxu0 %v135_v61  ;;  %v632_v60 = vld [vmem:[%s1395_s2] ss:$0 sm:$0xff] }
  0x51   :  { %865 = vmatpush3.msra.mxu1 %v135_v61  ;;  %783 = vmatprep.subr.mxu0 %v150_v62 }
  0x52   :  { %850 = vmatprep.subr.mxu1 %v150_v62  ;;  %784 = vmatpush3.msra.mxu0 %v134_v63 }
  0x53   :  { %866 = vmatpush3.msra.mxu1 %v134_v63  ;;  %474 = vmatprep.mubr.f32.mxu0 %v19_v0 }
  0x54   :  { %504 = vmatprep.mubr.f32.mxu1 %v61_v1  ;;  %475 = vmatmul.mubr.f32.vlgmr.msra.gmra.mxu0 %v18_v2 }
  0x55   :  { %505 = vmatmul.mubr.f32.vlgmr.msra.gmra.mxu1 %v60_v3  ;;  %479 = vmatprep.mubr.f32.mxu0 %v26_v4 }
  0x56   :  { %509 = vmatprep.mubr.f32.mxu1 %v68_v5  ;;  %819 = vmatprep.subr.mxu1 %v167_v6 }
  0x57   :  { %820 = vmatpush3.msra.mxu1 %v167_v6 }
  0x58   :  { %480 = vmatmul.mubr.f32.gmra.mxu0 %v25_v7  ;;  %821 = vmatprep.subr.mxu1 %v166_v9 }
  0x59   :  { %510 = vmatmul.mubr.f32.gmra.mxu1 %v67_v8  ;;  %484 = vmatprep.mubr.f32.mxu0 %v33_v10 }
  0x5a   :  { %822 = vmatpush3.msra.mxu1 %v166_v9  ;;  %823 = vmatprep.mubr.msk.f32.mxu1 %vm175_vm0, %v20_v11 }
  0x5c   :  { %485 = vmatmul.mubr.f32.gmra.mxu0 %v32_v12 }
  0x5d   :  { %824 = vmatmul.mubr.msk.f32.vlgmr.msra.gmra.mxu1 %vm175_vm0, %v27_v13  ;;  %489 = vmatprep.mubr.f32.mxu0 %v40_v14 }
  0x5e   :  { %826 = vmatprep.mubr.msk.f32.mxu1 %vm175_vm0, %v34_v15 }
  0x60   :  { %490 = vmatmul.mubr.f32.gmra.mxu0 %v39_v16 }
  0x61   :  { %827 = vmatmul.mubr.msk.f32.gmra.mxu1 %vm175_vm0, %v41_v17  ;;  %494 = vmatprep.mubr.f32.mxu0 %v47_v18 }
  0x62   :  { %829 = vmatprep.mubr.msk.f32.mxu1 %vm175_vm0, %v48_v19 }
  0x64   :  { %495 = vmatmul.mubr.f32.gmra.mxu0 %v46_v20 }
  0x65   :  { %830 = vmatmul.mubr.msk.f32.gmra.mxu1 %vm175_vm0, %v55_v21  ;;  %499 = vmatprep.mubr.f32.mxu0 %v54_v22 }
  0x66   :  { %832 = vmatprep.mubr.msk.f32.mxu1 %vm175_vm0, %v62_v23 }
  0x68   :  { %500 = vmatmul.mubr.f32.gmra.mxu0 %v53_v24 }
  0x69   :  { %833 = vmatmul.mubr.msk.f32.gmra.mxu1 %vm175_vm0, %v69_v25 }
  0xe4   :  { %v673_v26 = vpop.f32.mrf.mxu0 }
  0xe5   :  { %v729_v27 = vpop.f32.mrf.mxu1 }
  0xe6   :  { %v674_v28 = vpop.f32.mrf.mxu0 }
  0xe7   :  { %v730_v29 = vpop.f32.mrf.mxu1  ;;  %v675_v58 = vadd.f32 %v674_v28, %v673_v26 }
  0xe8   :  { %v731_v3 = vadd.f32 %v730_v29, %v729_v27 }
  0xe9   :  { %v267_v2 = vadd.f32 %v675_v58, %v632_v60 }
  0xea   :  { %v676_v30 = vpop.f32.mrf.mxu0 }
  0xeb   :  { %v732_v31 = vpop.f32.mrf.mxu1  ;;  %v372_v14 = vadd.f32 %v731_v3, %v267_v2 }
  0xec   :  { %v677_v32 = vpop.f32.mrf.mxu0 }
  0xed   :  { %v733_v33 = vpop.f32.mrf.mxu1  ;;  %v678_v59 = vadd.f32 %v677_v32, %v676_v30 }
  0xee   :  { %v734_v5 = vadd.f32 %v733_v33, %v732_v31 }
  0xef   :  { %v272_v4 = vadd.f32 %v678_v59, %v632_v60 }
  0xf0   :  { %v679_v34 = vpop.f32.mrf.mxu0 }
  0xf1   :  { %v735_v35 = vpop.f32.mrf.mxu1  ;;  %v377_v15 = vadd.f32 %v734_v5, %v272_v4 }
  0xf2   :  { %v680_v36 = vpop.f32.mrf.mxu0 }
  0xf3   :  { %v736_v37 = vpop.f32.mrf.mxu1  ;;  %v681_v63 = vadd.f32 %v680_v36, %v679_v34 }
  0xf4   :  { %v737_v11 = vadd.f32 %v736_v37, %v735_v35 }
  0xf5   :  { %v277_v10 = vadd.f32 %v681_v63, %v632_v60 }
  0xf6   :  { %v682_v38 = vpop.f32.mrf.mxu0 }
  0xf7   :  { %v738_v39 = vpop.f32.mrf.mxu1  ;;  %v382_v24 = vadd.f32 %v737_v11, %v277_v10 }
  0xf8   :  { %v683_v40 = vpop.f32.mrf.mxu0 }
  0xf9   :  { %v739_v41 = vpop.f32.mrf.mxu1  ;;  %v684_v8 = vadd.f32 %v683_v40, %v682_v38 }
  0xfa   :  { %v740_v17 = vadd.f32 %v739_v41, %v738_v39 }
  0xfb   :  { %v282_v20 = vadd.f32 %v684_v8, %v632_v60 }
  0xfc   :  { %v685_v42 = vpop.f32.mrf.mxu0 }
  0xfd   :  { %v1357_v43 = vpop.f32.mrf.mxu1  ;;  %v387_v34 = vadd.f32 %v740_v17, %v282_v20 }
  0xfe   :  { %v686_v44 = vpop.f32.mrf.mxu0 }
  0xff   :  { %v742_v45 = vpop.f32.mrf.mxu1  ;;  %v687_v25 = vadd.f32 %v686_v44, %v685_v42 }
 0x100   :  { %v743_v39 = vadd.f32 %v742_v45, %v1357_v43 }
 0x101   :  { %v287_v38 = vadd.f32 %v687_v25, %v632_v60 }
 0x102   :  { %v688_v46 = vpop.f32.mrf.mxu0 }
 0x103   :  { %v1359_v47 = vpop.f32.mrf.mxu1  ;;  %v392_v63 = vadd.f32 %v743_v39, %v287_v38 }
 0x104   :  { %v689_v48 = vpop.f32.mrf.mxu0 }
 0x105   :  { %v1361_v49 = vpop.f32.mrf.mxu1  ;;  %v690_v40 = vadd.f32 %v689_v48, %v688_v46 }
 0x106   :  { %v746_v43 = vadd.f32 %v1361_v49, %v1359_v47 }
 0x108   :  { %v691_v50 = vpop.f32.mrf.mxu0 }
 0x109   :  { %v747_v51 = vpop.f32.mrf.mxu1 }
 0x10a   :  { %v692_v52 = vpop.f32.mrf.mxu0 }
 0x10b   :  { %v748_v53 = vpop.f32.mrf.mxu1  ;;  %v693_v28 = vadd.f32 %v692_v52, %v691_v50 }
 0x10c   :  { %v749_v41 = vadd.f32 %v748_v53, %v747_v51 }
 0x10d   :  { %v297_v50 = vadd.f32 %v693_v28, %v632_v60 }
 0x10e   :  { %v694_v54 = vpop.f32.mrf.mxu0 }
 0x10f   :  { %v750_v55 = vpop.f32.mrf.mxu1  ;;  %v402_v48 = vadd.f32 %v749_v41, %v297_v50 }
 0x110   :  { %v695_v56 = vpop.f32.mrf.mxu0 }
 0x111   :  { %v751_v57 = vpop.f32.mrf.mxu1  ;;  %v696_v21 = vadd.f32 %v695_v56, %v694_v54 }
 0x112   :  { %v752_v36 = vadd.f32 %v751_v57, %v750_v55 }
 0x113   :  { %v302_v35 = vadd.f32 %v696_v21, %v632_v60 }
 0x114   :  { %v785_v61 = vpop.f32.mrf.mxu0 }
 0x115   :  { %v803_v62 = vpop.f32.mrf.mxu1  ;;  %v407_v58 = vadd.f32 %v752_v36, %v302_v35 }
 0x116   :  { %v786_v0 = vpop.f32.mrf.mxu0 }
 0x117   :  { %v804_v1 = vpop.f32.mrf.mxu1  ;;  %v787_v9 = vadd.f32 %v786_v0, %v785_v61  ;;  %v292_v0 = vadd.f32 %v690_v40, %v632_v60 }
 0x118   :  { %v788_v6 = vpop.f32.mrf.mxu0  ;;  %v805_v59 = vadd.f32 %v804_v1, %v803_v62 }
 0x119   :  { %v806_v7 = vpop.f32.mrf.mxu1  ;;  %v477_v23 = vadd.f32 %v787_v9, %v372_v14 }
 0x11a   :  { %v789_v12 = vpop.f32.mrf.mxu0  ;;  %v507_v5 = vadd.f32 %v805_v59, %v402_v48 }
 0x11b   :  { %v807_v13 = vpop.f32.mrf.mxu1  ;;  %v790_v16 = vadd.f32 %v789_v12, %v788_v6 }
 0x11c   :  { %v791_v18 = vpop.f32.mrf.mxu0  ;;  %v808_v52 = vadd.f32 %v807_v13, %v806_v7  ;;  %v397_v7 = vadd.f32 %v746_v43, %v292_v0 }
 0x11d   :  { %v825_v19 = vpop.f32.mrf.mxu1  ;;  %v482_v22 = vadd.f32 %v790_v16, %v377_v15 }
 0x11e   :  { %v792_v26 = vpop.f32.mrf.mxu0  ;;  %v512_v2 = vadd.f32 %v808_v52, %v407_v58 }
 0x11f   :  { %v581_v27 = vpop.f32.mrf.mxu1  ;;  %v587_v29 = vadd.f32 %v825_v19, %v482_v22  ;;  %v793_v30 = vadd.f32 %v792_v26, %v791_v18 }
 0x120   :  { %v582_v31 = vadd.f32 %v581_v27, %v477_v23  ;;  %v794_v32 = vpop.f32.mrf.mxu0 }
 0x121   :  { %v828_v33 = vpop.f32.mrf.mxu1  ;;  %621 = vst [vmem:[%s1396_s3 + $0x8] sm:$0xff] %v587_v29  ;;  %v487_v37 = vadd.f32 %v793_v30, %v382_v24 }
 0x122   :  { %620 = vst [vmem:[%s1396_s3] sm:$0xff] %v582_v31  ;;  %v795_v42 = vpop.f32.mrf.mxu0 }
 0x123   :  { %v591_v44 = vpop.f32.mrf.mxu1  ;;  %v796_v54 = vadd.f32 %v795_v42, %v794_v32 }
 0x124   :  { %v592_v55 = vadd.f32 %v591_v44, %v487_v37  ;;  %v797_v56 = vpop.f32.mrf.mxu0 }
 0x125   :  { %v831_v57 = vpop.f32.mrf.mxu1  ;;  %v492_v61 = vadd.f32 %v796_v54, %v387_v34 }
 0x126   :  { %622 = vst [vmem:[%s1396_s3 + $0x10] sm:$0xff] %v592_v55  ;;  %v798_v45 = vpop.f32.mrf.mxu0 }
 0x127   :  { %v601_v46 = vpop.f32.mrf.mxu1  ;;  %v597_v51 = vadd.f32 %v828_v33, %v492_v61  ;;  %v799_v53 = vadd.f32 %v798_v45, %v797_v56 }
 0x128   :  { %v800_v3 = vpop.f32.mrf.mxu0 }
 0x129   :  { %v834_v4 = vpop.f32.mrf.mxu1  ;;  %623 = vst [vmem:[%s1396_s3 + $0x18] sm:$0xff] %v597_v51  ;;  %v497_v62 = vadd.f32 %v799_v53, %v392_v63 }
 0x12a   :  { %v617_v1 = vadd.f32 %v834_v4, %v512_v2  ;;  %v801_v6 = vpop.f32.mrf.mxu0 }
 0x12b   :  { %v611_v60 = vpop.f32.mrf.mxu1  ;;  %v602_v8 = vadd.f32 %v601_v46, %v497_v62  ;;  %v802_v47 = vadd.f32 %v801_v6, %v800_v3 }
 0x12c   :  { %627 = vst [vmem:[%s1396_s3 + $0x38] sm:$0xff] %v617_v1  ;;  %v612_v49 = vadd.f32 %v611_v60, %v507_v5 }
 0x12d   :  { %624 = vst [vmem:[%s1396_s3 + $0x20] sm:$0xff] %v602_v8  ;;  %v502_v9 = vadd.f32 %v802_v47, %v397_v7 }
 0x12e   :  { %626 = vst [vmem:[%s1396_s3 + $0x30] sm:$0xff] %v612_v49 }
 0x12f   :  { %v607_v10 = vadd.f32 %v831_v57, %v502_v9 }
 0x131   :  { %625 = vst [vmem:[%s1396_s3 + $0x28] sm:$0xff] %v607_v10 }

</bundles_post_ra>
